<compile_context>
chip_gen: v7x
topology: tpu7x:2x2x1
jax: 0.10.0
libtpu: 0.0.40
codegen_flags: <defaults>
</compile_context>

<pallas_src>
import jax
import jax.numpy as jnp
from jax.experimental import pallas as pl
from jax.experimental.pallas import tpu as pltpu

LANE = 128
SUBLANE = 8
NEG_BIG = -1e30  # padded-action-column bias: exp underflows to exactly 0


def _round_up(n, m):
    return ((n + m - 1) // m) * m


def _cdiv(a, b):
    return -(-a // b)


def mlp_kernel(x_ref, w1_ref, b1_ref, w2_ref, b2_ref, w3_ref, b3_ref, out_ref):
    # Hidden layer 1: Linear + ReLU (bf16 MXU operands, f32 accumulate).
    x = x_ref[...].astype(jnp.bfloat16)
    h1 = jnp.dot(x, w1_ref[...], preferred_element_type=jnp.float32)
    h1 = jnp.maximum(h1 + b1_ref[...], 0.0)
    # Hidden layer 2: Linear + ReLU.
    h2 = jnp.dot(h1.astype(jnp.bfloat16), w2_ref[...],
                 preferred_element_type=jnp.float32)
    h2 = jnp.maximum(h2 + b2_ref[...], 0.0)
    # Final layer: Linear + Softmax(dim=1). Padded action columns have zero
    # weights and a NEG_BIG bias -> exp()==0 -> no effect on the denominator.
    logits = jnp.dot(h2.astype(jnp.bfloat16), w3_ref[...],
                     preferred_element_type=jnp.float32)
    logits = logits + b3_ref[...]
    m = jnp.max(logits, axis=-1, keepdims=True)
    e = jnp.exp(logits - m)
    denom = jnp.sum(e, axis=-1, keepdims=True)
    # Exact division so each row sums to 1 (callers expect a true softmax).
    out_ref[...] = (e / denom).astype(out_ref.dtype)


def prepare_padded_params(params):
    """Pad hidden dim to 128 lanes, action dim to 8; cast weights to bf16.

    Zero-padded hidden units give ReLU(0)=0 and contribute nothing downstream
    (exact). Padded action columns get zero weights + NEG_BIG bias so the
    softmax ignores them exactly.
    """
    w1, b1 = params["w1"], params["b1"]
    w2, b2 = params["w2"], params["b2"]
    w3, b3 = params["w3"], params["b3"]
    S, H = w1.shape
    A = w3.shape[1]
    Hp = _round_up(H, LANE)
    Ap = _round_up(A, SUBLANE)  # narrow output: only pad to sublane multiple

    w1p = jnp.zeros((S, Hp), jnp.bfloat16).at[:, :H].set(w1.astype(jnp.bfloat16))
    b1p = jnp.zeros((1, Hp), jnp.float32).at[:, :H].set(b1.reshape(1, H))
    w2p = jnp.zeros((Hp, Hp), jnp.bfloat16).at[:H, :H].set(w2.astype(jnp.bfloat16))
    b2p = jnp.zeros((1, Hp), jnp.float32).at[:, :H].set(b2.reshape(1, H))
    w3p = jnp.zeros((Hp, Ap), jnp.bfloat16).at[:H, :A].set(w3.astype(jnp.bfloat16))
    b3p = jnp.full((1, Ap), NEG_BIG, jnp.float32).at[:, :A].set(b3.reshape(1, A))
    return w1p, b1p, w2p, b2p, w3p, b3p


def _choose_tiling(batch, max_batch_tile, megacore_min_rows=512):
    """Pick (batch_tile, num_grid_steps) with <= ~8 padded rows per step and
    >= 2 steps for large batches (so v7x can split across its 2 TensorCores)."""
    num_steps = max(1, _cdiv(batch, max_batch_tile))
    if num_steps == 1 and batch >= 2 * megacore_min_rows:
        num_steps = 2
    tb = max(SUBLANE, _round_up(_cdiv(batch, num_steps), SUBLANE))
    return tb, num_steps


def neural_network_forward(x, params, *, max_batch_tile=2048, min_pallas_batch=0):
    """x: (B, state_size) float32. params: dict of unpadded f32 weights/biases.

    max_batch_tile=2048 keeps per-step VMEM (~3-4 MiB incl. double buffers and
    f32 intermediates) well under the default scoped limit on v5e/v6e/v7x.
    """
    B, S = x.shape
    A = params["w3"].shape[1]

    if B < min_pallas_batch:
        # Tiny batches are pure launch/pipeline-prologue overhead for the
        # custom kernel; let XLA fuse the three small matmuls instead.
        return reference_forward(x, params)

    w1p, b1p, w2p, b2p, w3p, b3p = prepare_padded_params(params)
    Hp = w1p.shape[1]
    Ap = w3p.shape[1]

    TB, num_steps = _choose_tiling(B, max_batch_tile)
    B_pad = TB * num_steps
    if B_pad != B:
        x = jnp.pad(x, ((0, B_pad - B), (0, 0)))

    const2 = lambda i: (0, 0)  # weights/biases: same block every step -> VMEM-resident
    out = pl.pallas_call(
        mlp_kernel,
        out_shape=jax.ShapeDtypeStruct((B_pad, Ap), jnp.float32),
        grid=(num_steps,),
        in_specs=[
            pl.BlockSpec((TB, S), lambda i: (i, 0)),   # x tile (pipelined)
            pl.BlockSpec((S, Hp), const2),             # w1
            pl.BlockSpec((1, Hp), const2),             # b1
            pl.BlockSpec((Hp, Hp), const2),            # w2
            pl.BlockSpec((1, Hp), const2),             # b2
            pl.BlockSpec((Hp, Ap), const2),            # w3
            pl.BlockSpec((1, Ap), const2),             # b3
        ],
        out_specs=pl.BlockSpec((TB, Ap), lambda i: (i, 0)),  # narrow output slab
        compiler_params=pltpu.CompilerParams(
            dimension_semantics=("parallel",)),        # megacore sharding on v7x
    )(x, w1p, b1p, w2p, b2p, w3p, b3p)
    return out[:B, :A]


def xavier_normal(key, fan_in, fan_out):
    """torch.nn.init.xavier_normal_ equivalent: N(0, sqrt(2/(fan_in+fan_out)))."""
    std = (2.0 / (fan_in + fan_out)) ** 0.5
    return std * jax.random.normal(key, (fan_in, fan_out), dtype=jnp.float32)


def init_params(key, state_size, action_size, hidden=64):
    k1, k2, k3 = jax.random.split(key, 3)
    # Weights stored pre-transposed: (in_features, out_features).
    return {
        "w1": xavier_normal(k1, state_size, hidden),
        "b1": jnp.zeros((1, hidden), dtype=jnp.float32),
        "w2": xavier_normal(k2, hidden, hidden),
        "b2": jnp.zeros((1, hidden), dtype=jnp.float32),
        "w3": xavier_normal(k3, hidden, action_size),
        "b3": jnp.zeros((1, action_size), dtype=jnp.float32),
    }


def reference_forward(x, params):
    """Pure-JAX reference with the same bf16-operand / f32-accumulate matmuls."""
    bf16 = jnp.bfloat16

    def dot(a, b):
        return jnp.dot(a.astype(bf16), b.astype(bf16),
                       preferred_element_type=jnp.float32)

    h1 = jnp.maximum(dot(x, params["w1"]) + params["b1"], 0.0)
    h2 = jnp.maximum(dot(h1, params["w2"]) + params["b2"], 0.0)
    logits = dot(h2, params["w3"]) + params["b3"]
    return jax.nn.softmax(logits, axis=1)


if __name__ == "__main__":
    state_size = 16
    action_size = 4
    batch = 2

    key = jax.random.PRNGKey(0)
    k_x, k_p = jax.random.split(key)
    x = jax.random.normal(k_x, (batch, state_size), dtype=jnp.float32)
    params = init_params(k_p, state_size, action_size, hidden=64)

    # Force the Pallas path (min_pallas_batch=0) so the kernel itself is tested.
    out = jax.block_until_ready(neural_network_forward(x, params, min_pallas_batch=0))
    ref = reference_forward(x, params)
    assert out.shape == (batch, action_size)
    assert jnp.allclose(out, ref, atol=5e-3, rtol=5e-3)
    # Exact-division softmax: rows sum to 1 over the real action columns.
    assert jnp.allclose(jnp.sum(out, axis=1), jnp.ones((batch,)), atol=1e-3)

    # Multi-tile path: exercises batch padding, >1 grid step and pipelining.
    batch2 = 200
    x2 = jax.random.normal(jax.random.PRNGKey(1), (batch2, state_size),
                           dtype=jnp.float32)
    out2 = jax.block_until_ready(
        neural_network_forward(x2, params, max_batch_tile=64, min_pallas_batch=0))
    ref2 = reference_forward(x2, params)
    assert out2.shape == (batch2, action_size)
    assert jnp.allclose(out2, ref2, atol=5e-3, rtol=5e-3)
    assert jnp.allclose(jnp.sum(out2, axis=1), jnp.ones((batch2,)), atol=1e-3)

    # TODO(synk): 'DUELLING_NN' raises in the reference module; 'A2C' heads use
    # the same Linear primitive and are omitted since model_type='VANILLA_NN'.
    print("KERNEL_OK")
</pallas_src>

<mosaic_0001>
module attributes {stable_mosaic.version = 11 : i64} {
  func.func @mlp_kernel(%arg0: i32, %arg1: memref<8x16xf32, #tpu.memory_space<vmem>>, %arg2: memref<16x128xbf16, #tpu.memory_space<vmem>>, %arg3: memref<1x128xf32, #tpu.memory_space<vmem>>, %arg4: memref<128x128xbf16, #tpu.memory_space<vmem>>, %arg5: memref<1x128xf32, #tpu.memory_space<vmem>>, %arg6: memref<128x8xbf16, #tpu.memory_space<vmem>>, %arg7: memref<1x8xf32, #tpu.memory_space<vmem>>, %arg8: memref<8x8xf32, #tpu.memory_space<vmem>>) attributes {dimension_semantics = [#tpu.dimension_semantics<parallel>], iteration_bounds = array<i64: 1>, scalar_prefetch = 0 : i64, scratch_operands = 0 : i64, tpu.core_type = #tpu.core_type<tc>, window_params = [{transform_indices = @transform_0, window_bounds = array<i64: 8, 16>}, {pipeline_mode = #tpu.pipeline_mode<synchronous>, transform_indices = @transform_1, window_bounds = array<i64: 16, 128>}, {pipeline_mode = #tpu.pipeline_mode<synchronous>, transform_indices = @transform_2, window_bounds = array<i64: 1, 128>}, {pipeline_mode = #tpu.pipeline_mode<synchronous>, transform_indices = @transform_3, window_bounds = array<i64: 128, 128>}, {pipeline_mode = #tpu.pipeline_mode<synchronous>, transform_indices = @transform_4, window_bounds = array<i64: 1, 128>}, {pipeline_mode = #tpu.pipeline_mode<synchronous>, transform_indices = @transform_5, window_bounds = array<i64: 128, 8>}, {pipeline_mode = #tpu.pipeline_mode<synchronous>, transform_indices = @transform_6, window_bounds = array<i64: 1, 8>}, {transform_indices = @transform_7, window_bounds = array<i64: 8, 8>}]} {
    %c0 = arith.constant 0 : index
    %c0_0 = arith.constant 0 : index
    %0 = vector.load %arg1[%c0, %c0_0] : memref<8x16xf32, #tpu.memory_space<vmem>>, vector<8x16xf32>
    %1 = arith.truncf %0 : vector<8x16xf32> to vector<8x16xbf16>
    %c0_1 = arith.constant 0 : index
    %c0_2 = arith.constant 0 : index
    %2 = vector.load %arg2[%c0_1, %c0_2] : memref<16x128xbf16, #tpu.memory_space<vmem>>, vector<16x128xbf16>
    %cst = arith.constant dense<0.000000e+00> : vector<8x128xf32>
    %3 = tpu.matmul %1, %2, %cst {dimension_numbers = #tpu.dot_dimension_numbers<[1], [0], [0], [1], [0, 0, 1, 1], [], []>} : vector<8x16xbf16>, vector<16x128xbf16>, vector<8x128xf32> -> vector<8x128xf32>
    %c0_3 = arith.constant 0 : index
    %c0_4 = arith.constant 0 : index
    %4 = vector.load %arg3[%c0_3, %c0_4] : memref<1x128xf32, #tpu.memory_space<vmem>>, vector<1x128xf32>
    %5 = vector.broadcast %4 : vector<1x128xf32> to vector<8x128xf32>
    %6 = arith.addf %3, %5 : vector<8x128xf32>
    %cst_5 = arith.constant 0.000000e+00 : f32
    %7 = vector.broadcast %cst_5 : f32 to vector<8x128xf32>
    %8 = arith.maximumf %6, %7 : vector<8x128xf32>
    %9 = arith.truncf %8 : vector<8x128xf32> to vector<8x128xbf16>
    %c0_6 = arith.constant 0 : index
    %c0_7 = arith.constant 0 : index
    %10 = vector.load %arg4[%c0_6, %c0_7] : memref<128x128xbf16, #tpu.memory_space<vmem>>, vector<128x128xbf16>
    %cst_8 = arith.constant dense<0.000000e+00> : vector<8x128xf32>
    %11 = tpu.matmul %9, %10, %cst_8 {dimension_numbers = #tpu.dot_dimension_numbers<[1], [0], [0], [1], [0, 0, 1, 1], [], []>} : vector<8x128xbf16>, vector<128x128xbf16>, vector<8x128xf32> -> vector<8x128xf32>
    %c0_9 = arith.constant 0 : index
    %c0_10 = arith.constant 0 : index
    %12 = vector.load %arg5[%c0_9, %c0_10] : memref<1x128xf32, #tpu.memory_space<vmem>>, vector<1x128xf32>
    %13 = vector.broadcast %12 : vector<1x128xf32> to vector<8x128xf32>
    %14 = arith.addf %11, %13 : vector<8x128xf32>
    %cst_11 = arith.constant 0.000000e+00 : f32
    %15 = vector.broadcast %cst_11 : f32 to vector<8x128xf32>
    %16 = arith.maximumf %14, %15 : vector<8x128xf32>
    %17 = arith.truncf %16 : vector<8x128xf32> to vector<8x128xbf16>
    %c0_12 = arith.constant 0 : index
    %c0_13 = arith.constant 0 : index
    %18 = vector.load %arg6[%c0_12, %c0_13] : memref<128x8xbf16, #tpu.memory_space<vmem>>, vector<128x8xbf16>
    %cst_14 = arith.constant dense<0.000000e+00> : vector<8x8xf32>
    %19 = tpu.matmul %17, %18, %cst_14 {dimension_numbers = #tpu.dot_dimension_numbers<[1], [0], [0], [1], [0, 0, 1, 1], [], []>} : vector<8x128xbf16>, vector<128x8xbf16>, vector<8x8xf32> -> vector<8x8xf32>
    %c0_15 = arith.constant 0 : index
    %c0_16 = arith.constant 0 : index
    %20 = vector.load %arg7[%c0_15, %c0_16] : memref<1x8xf32, #tpu.memory_space<vmem>>, vector<1x8xf32>
    %21 = vector.broadcast %20 : vector<1x8xf32> to vector<8x8xf32>
    %22 = arith.addf %19, %21 : vector<8x8xf32>
    %cst_17 = arith.constant dense<0xFF800000> : vector<8xf32>
    %23 = vector.multi_reduction <maximumf>, %22, %cst_17 [1] : vector<8x8xf32> to vector<8xf32>
    %24 = vector.shape_cast %23 : vector<8xf32> to vector<8x1xf32>
    %25 = vector.broadcast %24 : vector<8x1xf32> to vector<8x8xf32>
    %26 = arith.subf %22, %25 : vector<8x8xf32>
    %27 = math.exp %26 : vector<8x8xf32>
    %cst_18 = arith.constant dense<0.000000e+00> : vector<8xf32>
    %28 = vector.multi_reduction <add>, %27, %cst_18 [1] : vector<8x8xf32> to vector<8xf32>
    %29 = vector.shape_cast %28 : vector<8xf32> to vector<8x1xf32>
    %30 = vector.broadcast %29 : vector<8x1xf32> to vector<8x8xf32>
    %31 = arith.divf %27, %30 : vector<8x8xf32>
    %c0_19 = arith.constant 0 : index
    %c0_20 = arith.constant 0 : index
    %32 = vector.load %arg8[%c0_19, %c0_20] : memref<8x8xf32, #tpu.memory_space<vmem>>, vector<8x8xf32>
    tpu.vector_store %arg8[%c0_19, %c0_20], %31 {strides = array<i32>} : memref<8x8xf32, #tpu.memory_space<vmem>>, vector<8x8xf32>,
    return
  }
  func.func @transform_0(%arg0: i32) -> (i32, i32) {
    %c0_i32 = arith.constant 0 : i32
    %c0_i32_0 = arith.constant 0 : i32
    return %arg0, %c0_i32 : i32, i32
  }
  func.func @transform_1(%arg0: i32) -> (i32, i32) {
    %c0_i32 = arith.constant 0 : i32
    %c0_i32_0 = arith.constant 0 : i32
    %c0_i32_1 = arith.constant 0 : i32
    return %c0_i32, %c0_i32_0 : i32, i32
  }
  func.func @transform_2(%arg0: i32) -> (i32, i32) {
    %c0_i32 = arith.constant 0 : i32
    %c0_i32_0 = arith.constant 0 : i32
    %c0_i32_1 = arith.constant 0 : i32
    return %c0_i32, %c0_i32_0 : i32, i32
  }
  func.func @transform_3(%arg0: i32) -> (i32, i32) {
    %c0_i32 = arith.constant 0 : i32
    %c0_i32_0 = arith.constant 0 : i32
    %c0_i32_1 = arith.constant 0 : i32
    return %c0_i32, %c0_i32_0 : i32, i32
  }
  func.func @transform_4(%arg0: i32) -> (i32, i32) {
    %c0_i32 = arith.constant 0 : i32
    %c0_i32_0 = arith.constant 0 : i32
    %c0_i32_1 = arith.constant 0 : i32
    return %c0_i32, %c0_i32_0 : i32, i32
  }
  func.func @transform_5(%arg0: i32) -> (i32, i32) {
    %c0_i32 = arith.constant 0 : i32
    %c0_i32_0 = arith.constant 0 : i32
    %c0_i32_1 = arith.constant 0 : i32
    return %c0_i32, %c0_i32_0 : i32, i32
  }
  func.func @transform_6(%arg0: i32) -> (i32, i32) {
    %c0_i32 = arith.constant 0 : i32
    %c0_i32_0 = arith.constant 0 : i32
    %c0_i32_1 = arith.constant 0 : i32
    return %c0_i32, %c0_i32_0 : i32, i32
  }
  func.func @transform_7(%arg0: i32) -> (i32, i32) {
    %c0_i32 = arith.constant 0 : i32
    %c0_i32_0 = arith.constant 0 : i32
    return %arg0, %c0_i32 : i32, i32
  }
}

</mosaic_0001>

<bundles_post_ra>
// kernel: tpu_custom_call.1
= control target key start
LH: loop header
LB: loop body
LE: loop exit
PB: predicated region body
PF: predicated region fallthrough
CT: control target
= control target key end

     0   :  { %12 = vsyncpa [#allocation3], 0  ;;  %s672_s0 = inlined_call_operand.vmem [shape: f32[8,16], index: 0, kind: input, shape index: {}]   ;;  %s673_s1 = inlined_call_operand.hbm [shape: bf16[16,128], index: 1, kind: input, shape index: {}]   ;;  %s674_s2 = inlined_call_operand.vmem [shape: f32[1,128], index: 2, kind: input, shape index: {}]   ;;  %s675_s3 = inlined_call_operand.vmem [shape: bf16[128,128], index: 3, kind: input, shape index: {}]   ;;  %s676_s4 = inlined_call_operand.vmem [shape: f32[1,128], index: 4, kind: input, shape index: {}]   ;;  %s677_s5 = inlined_call_operand.vmem [shape: bf16[128,8], index: 5, kind: input, shape index: {}]   ;;  %s678_s6 = inlined_call_operand.vmem [shape: f32[1,8], index: 6, kind: input, shape index: {}]   ;;  %s679_s7 = inlined_call_operand.hbm [shape: f32[8,8], index: 7, kind: output, shape index: {}]  }
   0x1   :  { %13 = vsyncpa [#allocation4], 0  ;;  %s519_s24 = smov [#allocation2]   ;;  %s471_s28 = scalar_lea.hbm %s673_s1, 128 }
   0x2   :  { %s21_s25 = sshll.u32 %s519_s24, 4  ;;  %p472_p0 = scmp.ne.s32.totalorder %s673_s1, %s471_s28  ;;  %s22_s25 = int_to_ptr.vmem [resolvable:$true] %s21_s25 }
   0x3   :  { %p475_p1 = scmp.lt.u32.totalorder %s471_s28, %s673_s1 }
   0x5   :  { %p477_p2 = pnand %p475_p1, %p472_p0 }
   0x7   :  { %480 = shalt.err (!%p477_p2)
}
   0x8   :  { %s481_s10 = scalar_lea.vmem %s22_s25, 128  ;;  %p486_p4 = scmp.lt.s32.totalorder %s22_s25, %s22_s25 }
   0x9   :  { %p482_p3 = scmp.ne.s32.totalorder %s22_s25, %s481_s10  ;;  %p487_p5 = scmp.lt.s32.totalorder %s481_s10, %s481_s10 }
   0xb   :  { %p488_p6 = por %p487_p5, %p486_p4 }
   0xd   :  { %p489_p7 = pnand %p488_p6, %p482_p3 }
   0xf   :  { %492 = shalt.err (!%p489_p7)
}
  0x10   :  { %s520_s11 = smov 64   ;;  %s521_s12 = smov 4  }
  0x11   :  { %27 = dma.hbm_to_vmem [thread:$0]  %s673_s1, 128, %s22_s25, [#allocation3], %s520_s11, %s520_s11, %s521_s12  }
  0x12   :  { %515 = dma.done.wait [#allocation3], 128  }
  0x13   :  { %516 = vsyncadd [#allocation3], 4294967168  ;;  %v522_v0 = vmov 0.0   ;;  %vm523_vm0 = vmmov 0   ;;  %v450_v1 = vld [vmem:[#allocation2] sm:$0xff]   ;;  %vm59_vm1 = vcmask 130048  }
  0x14   :  { %398 = vmatprep.subr.bf16.mxu0 %v522_v0  ;;  %400 = vmatprep.mubr.msk.bf16.mxu0 %vm523_vm0, %v522_v0  ;;  %v42_v2 = vld [vmem:[%s672_s0] sm:$0xff]  ;;  %v452_v5 = vld [vmem:[%s675_s3 + $0x8] sm:$0xff]   ;;  %v453_v6 = vld [vmem:[%s675_s3 + $0x10] sm:$0xff]   ;;  %vm329_vm2 = vcmask 64512  }
  0x15   :  { %404 = vmatprep.subr.bf16.mxu1 %v522_v0  ;;  %420 = vmatprep.mubr.msk.bf16.mxu1 %vm523_vm0, %v522_v0  ;;  %v43_v3 = vpack.c.bf16 %v42_v2, %v42_v2  ;;  %v451_v4 = vld [vmem:[%s675_s3] sm:$0xff]   ;;  %v454_v7 = vld [vmem:[%s675_s3 + $0x18] sm:$0xff]   ;;  %v456_v9 = vld [vmem:[%s675_s3 + $0x28] sm:$0xff]  }
  0x16   :  { %399 = vmatpush3.bf16.msra.mxu0 %v450_v1  ;;  %405 = vmatpush3.bf16.msra.mxu1 %v451_v4  ;;  %v455_v8 = vld [vmem:[%s675_s3 + $0x20] sm:$0xff]   ;;  %v457_v10 = vld [vmem:[%s675_s3 + $0x30] sm:$0xff]   ;;  %v458_v11 = vld [vmem:[%s675_s3 + $0x38] sm:$0xff]  }
  0x17   :  { %424 = vmatprep.subr.bf16.mxu0 %v522_v0  ;;  %406 = vmatprep.subr.bf16.mxu1 %v522_v0  ;;  %v459_v12 = vld [vmem:[%s677_s5] sm:$0xff]   ;;  %v460_v13 = vld [vmem:[%s677_s5 + $0x8] sm:$0xff]   ;;  %v461_v14 = vld [vmem:[%s677_s5 + $0x10] sm:$0xff]  }
  0x18   :  { %v462_v15 = vld [vmem:[%s677_s5 + $0x18] sm:$0xff]   ;;  %v463_v16 = vld [vmem:[%s677_s5 + $0x20] sm:$0xff]   ;;  %v464_v17 = vld [vmem:[%s677_s5 + $0x28] sm:$0xff]  }
  0x19   :  { %401 = vmatmul.mubr.msk.bf16.vlgmr.msra.gmra.mrb[0].mxu0 %vm59_vm1, %v43_v3  ;;  %v357_v18 = vld [vmem:[%s674_s2] ss:$0 sm:$0xff]  ;;  %v465_v26 = vld [vmem:[%s677_s5 + $0x30] sm:$0xff]   ;;  %v466_v27 = vld [vmem:[%s677_s5 + $0x38] sm:$0xff]  }
  0x1a   :  { %440 = vmatprep.mubr.msk.bf16.mxu0 %vm523_vm0, %v522_v0  ;;  %407 = vmatpush3.bf16.msra.mxu1 %v452_v5  ;;  %v360_v28 = vld [vmem:[%s676_s4] ss:$0 sm:$0xff]  ;;  %s524_s4 = smov [#allocation5]  }
  0x1b   :  { %408 = vmatprep.subr.bf16.mxu1 %v522_v0  ;;  %425 = vmatpush3.bf16.msra.mxu0 %v459_v12  ;;  %v369_v36 = vld [vmem:[%s678_s6] ss:$0 sm:$0xff]  ;;  %s348_s5 = sshll.u32 %s524_s4, 4  ;;  %s349_s5 = int_to_ptr.vmem [resolvable:$true] %s348_s5 }
  0x1c   :  { %426 = vmatprep.subr.bf16.mxu0 %v522_v0  ;;  %s493_s6 = scalar_lea.vmem %s349_s5, 128  ;;  %p498_p9 = scmp.lt.s32.totalorder %s349_s5, %s349_s5 }
  0x1d   :  { %p494_p8 = scmp.ne.s32.totalorder %s349_s5, %s493_s6  ;;  %p499_p10 = scmp.lt.s32.totalorder %s493_s6, %s493_s6 }
  0x1e   :  { %409 = vmatpush3.bf16.msra.mxu1 %v453_v6 }
  0x1f   :  { %410 = vmatprep.subr.bf16.mxu1 %v522_v0  ;;  %427 = vmatpush3.bf16.msra.mxu0 %v460_v13  ;;  %p500_p11 = por %p499_p10, %p498_p9 }
  0x20   :  { %428 = vmatprep.subr.bf16.mxu0 %v522_v0 }
  0x21   :  { %p501_p12 = pnand %p500_p11, %p494_p8 }
  0x22   :  { %411 = vmatpush3.bf16.msra.mxu1 %v454_v7 }
  0x23   :  { %412 = vmatprep.subr.bf16.mxu1 %v522_v0  ;;  %429 = vmatpush3.bf16.msra.mxu0 %v461_v14 }
  0x24   :  { %430 = vmatprep.subr.bf16.mxu0 %v522_v0 }
  0x26   :  { %413 = vmatpush3.bf16.msra.mxu1 %v455_v8 }
  0x27   :  { %414 = vmatprep.subr.bf16.mxu1 %v522_v0  ;;  %431 = vmatpush3.bf16.msra.mxu0 %v462_v15 }
  0x28   :  { %432 = vmatprep.subr.bf16.mxu0 %v522_v0 }
  0x2a   :  { %415 = vmatpush3.bf16.msra.mxu1 %v456_v9 }
  0x2b   :  { %416 = vmatprep.subr.bf16.mxu1 %v522_v0  ;;  %433 = vmatpush3.bf16.msra.mxu0 %v463_v16 }
  0x2c   :  { %434 = vmatprep.subr.bf16.mxu0 %v522_v0 }
  0x2e   :  { %417 = vmatpush3.bf16.msra.mxu1 %v457_v10 }
  0x2f   :  { %418 = vmatprep.subr.bf16.mxu1 %v522_v0  ;;  %435 = vmatpush3.bf16.msra.mxu0 %v464_v17 }
  0x30   :  { %436 = vmatprep.subr.bf16.mxu0 %v522_v0 }
  0x32   :  { %419 = vmatpush3.bf16.msra.mxu1 %v458_v11 }
  0x33   :  { %437 = vmatpush3.bf16.msra.mxu0 %v465_v26 }
  0x34   :  { %438 = vmatprep.subr.bf16.mxu0 %v522_v0 }
  0x37   :  { %439 = vmatpush3.bf16.msra.mxu0 %v466_v27 }
  0xec   :  { %v97_v19 = vpop.f32.mrb[0].mxu0 }
  0xed   :  { %v98_v20 = vadd.f32 %v357_v18, %v97_v19  ;;  %v402_v21 = vpop.f32.mrb[1].mxu0 }
  0xee   :  { %v100_v22 = vpop.f32.mrb[2].mxu0 }
  0xef   :  { %v103_v23 = vmax.f32 %v98_v20, 0.0  ;;  %v403_v24 = vpop.f32.mrb[3].mxu0 }
  0xf1   :  { %v104_v25 = vpack.c.bf16 %v103_v23, %v103_v23 }
  0xf3   :  { %421 = vmatmul.mubr.bf16.vlgmr.msra.gmra.mrb[0].mxu1 %v104_v25 }
 0x1c6   :  { %v210_v29 = vpop.f32.mrb[0].mxu1 }
 0x1c7   :  { %v211_v30 = vadd.f32 %v360_v28, %v210_v29  ;;  %v422_v31 = vpop.f32.mrb[1].mxu1 }
 0x1c8   :  { %v213_v32 = vpop.f32.mrb[2].mxu1 }
 0x1c9   :  { %v216_v33 = vmax.f32 %v211_v30, 0.0  ;;  %v423_v34 = vpop.f32.mrb[3].mxu1 }
 0x1cb   :  { %v217_v35 = vpack.c.bf16 %v216_v33, %v216_v33 }
 0x1cd   :  { %441 = vmatmul.mubr.bf16.vlgmr.msra.gmra.mrb[4].mxu0 %v217_v35 }
 0x2a0   :  { %v323_v37 = vpop.f32.mrb[4].mxu0 }
 0x2a1   :  { %v324_v38 = vadd.f32 %v369_v36, %v323_v37  ;;  %v442_v39 = vpop.f32.mrb[5].mxu0 }
 0x2a2   :  { %v326_v40 = vpop.f32.mrb[6].mxu0 }
 0x2a3   :  { %v443_v41 = vpop.f32.mrb[7].mxu0  ;;  %v330_v42 = vsel %vm329_vm2, %v324_v38, -inf }
 0x2a4   :  { %331 = vmax.xlane.f32.xlu0 %v330_v42 }
 0x331   :  { %v332_v43 = vpop.xlane.xlu0 %331 }
 0x332   :  { %v333_v44 = vsub.f32 %v324_v38, %v332_v43 }
 0x334   :  { %v334_v45 = vmul.f32 1.442695, %v333_v44 }
 0x336   :  { %467 = vpow2.f32 %v334_v45 }
 0x340   :  { %v468_v46 = vpop.eup %467 }
 0x341   :  { %v336_v47 = vsel %vm329_vm2, %v468_v46, 0.0 }
 0x342   :  { %337 = vadd.xlane.f32.xlu0 %v336_v47 }
 0x3cf   :  { %v338_v48 = vpop.xlane.xlu0 %337 }
 0x3d0   :  { %469 = vrcp.f32 %v338_v48 }
 0x3da   :  { %v470_v49 = vpop.eup %469 }
 0x3db   :  { %v340_v50 = vmul.f32 %v470_v49, %v468_v46 }
 0x3dd   :  { %341 = vst.msk [vmem:[#allocation5] sm:$0xff] %vm329_vm2, %v340_v50 }
 0x3de   :  { %504 = shalt.err (!%p501_p12)
}
 0x3df   :  { %s505_s28 = scalar_lea.hbm %s679_s7, 128 }
 0x3e0   :  { %p506_p13 = scmp.ne.s32.totalorder %s679_s7, %s505_s28  ;;  %p509_p0 = scmp.lt.u32.totalorder %s505_s28, %s679_s7 }
 0x3e2   :  { %p511_p1 = pnand %p509_p0, %p506_p13 }
 0x3e4   :  { %514 = shalt.err (!%p511_p1)
}
 0x3e5   :  { %351 = dma.vmem_to_hbm [thread:$0]  %s349_s5, 128, %s679_s7, [#allocation4]  }
 0x3e6   :  { %517 = dma.done.wait [#allocation4], 128  }
 0x3e7   :  { %518 = vsyncadd [#allocation4], 4294967168 }
 0x3e8   :  { %355 = vsyncpa [#allocation3], 1 }
 0x3e9   :  { %356 = vsyncpa [#allocation4], 1 }

</bundles_post_ra>
